<compile_context>
chip_gen: v5e
topology: v5e:2x2
jax: 0.10.0
libtpu: 0.0.40
codegen_flags: <defaults>
</compile_context>

<pallas_src>
import math

import jax
import jax.numpy as jnp
from jax import lax
from jax.experimental import pallas as pl
from jax.experimental.pallas import tpu as pltpu


def _round_up(a: int, b: int) -> int:
    return ((a + b - 1) // b) * b


def _vmem_limit(estimate_bytes: int) -> int:
    # Give the compiler headroom but stay comfortably under v7x's 64 MiB
    # physical VMEM (v5e/v6e have 128 MiB, so this is safe everywhere).
    return int(min(56 * 2**20, max(32 * 2**20, int(estimate_bytes * 1.5))))


# x(m,k) . w(n,k) contracting dim 1 of both  ==  x @ w.T  (no wrapper transpose)
_MXU_CONTRACT = (((1,), (1,)), ((), ()))


def _linear_relu_kernel(x_ref, w_ref, b_ref, o_ref):
    """Single-K-block path: whole reduction dim in one tile, no scratch."""
    acc = lax.dot_general(x_ref[...], w_ref[...], _MXU_CONTRACT,
                          preferred_element_type=jnp.float32)
    acc = acc + b_ref[...].astype(jnp.float32)
    o_ref[...] = jnp.maximum(acc, jnp.float32(0.0)).astype(o_ref.dtype)


def _linear_relu_acc_kernel(x_ref, w_ref, b_ref, o_ref, acc_ref):
    """Streaming-K path: f32 VMEM accumulator resident across the K grid axis."""
    k = pl.program_id(2)

    @pl.when(k == 0)
    def _():
        acc_ref[...] = jnp.zeros_like(acc_ref)

    acc_ref[...] += lax.dot_general(x_ref[...], w_ref[...], _MXU_CONTRACT,
                                    preferred_element_type=jnp.float32)

    @pl.when(k == pl.num_programs(2) - 1)
    def _():
        out = acc_ref[...] + b_ref[...].astype(jnp.float32)
        o_ref[...] = jnp.maximum(out, jnp.float32(0.0)).astype(o_ref.dtype)


def ema_layer_forward(x: jax.Array,
                      weight: jax.Array,
                      bias: jax.Array,
                      *,
                      tm: int = 512,
                      tn: int = 512,
                      tk: int = 1024,
                      single_k_budget_bytes: int = 36 * 2**20,
                      allow_xla_fallback: bool = True) -> jax.Array:
    """relu(x @ weight.T + bias).  x: (..., K), weight: (N, K), bias: (N,)."""
    orig_lead = x.shape[:-1]
    K = x.shape[-1]
    N, Kw = weight.shape
    assert Kw == K, "weight must be (hidden_out, hidden_in)"
    M = int(math.prod(orig_lead)) if orig_lead else 1
    dtype = x.dtype

    if M == 0:  # degenerate empty batch
        return jnp.zeros((*orig_lead, N), dtype)

    # Tiny problems: pallas_call fixed overhead dominates; let XLA fuse it.
    if allow_xla_fallback and M * N * K <= 128 * 128 * 128:
        out = jnp.maximum(
            jnp.dot(x.reshape(M, K), jnp.swapaxes(weight, 0, 1).astype(dtype),
                    preferred_element_type=jnp.float32)
            + bias.astype(jnp.float32),
            0.0)
        return out.astype(dtype).reshape(*orig_lead, N)

    x2 = x.reshape(M, K)
    w = weight if weight.dtype == dtype else weight.astype(dtype)
    b2 = (bias if bias.dtype == dtype else bias.astype(dtype)).reshape(1, N)
    isz = jnp.dtype(dtype).itemsize

    tm = min(tm, _round_up(M, 8))
    Mb = pl.cdiv(M, tm)

    # ---- Path 1: whole K (and whole weight) resident in VMEM ---------------
    single_k_bytes = 2 * (tm * K + N * K + N + tm * N) * isz
    if single_k_bytes <= single_k_budget_bytes:
        if Mb == 1 and N >= 256:
            # Small-M (decode-like) shape: split N so both v7x TCs get a block.
            tn1 = _round_up(-(-N // 2), 128)
        else:
            tn1 = N
        Nb = pl.cdiv(N, tn1)

        out = pl.pallas_call(
            _linear_relu_kernel,
            out_shape=jax.ShapeDtypeStruct((M, N), dtype),
            grid=(Mb, Nb),
            in_specs=[
                pl.BlockSpec((tm, K), lambda i, j: (i, 0)),    # x tile
                pl.BlockSpec((tn1, K), lambda i, j: (j, 0)),   # W panel (resident)
                pl.BlockSpec((1, tn1), lambda i, j: (0, j)),   # bias
            ],
            out_specs=pl.BlockSpec((tm, tn1), lambda i, j: (i, j)),
            compiler_params=pltpu.CompilerParams(
                dimension_semantics=("parallel", "parallel"),
                vmem_limit_bytes=_vmem_limit(single_k_bytes)),
        )(x2, w, b2)
        return out.reshape(*orig_lead, N)

    # ---- Path 2: stream K with an f32 accumulator ---------------------------
    tn = min(tn, _round_up(N, 128))
    tk = min(tk, _round_up(K, 128))
    Kp = _round_up(K, tk)
    if Kp != K:
        # Only K needs real zero-padding (garbage in the reduction dim would
        # corrupt valid outputs); M/N overhang is handled by masked stores.
        x2 = jnp.pad(x2, ((0, 0), (0, Kp - K)))
        w = jnp.pad(w, ((0, 0), (0, Kp - K)))

    grid = (Mb, pl.cdiv(N, tn), Kp // tk)
    stream_bytes = 2 * (tm * tk + tn * tk + tn + tm * tn) * isz + tm * tn * 4

    out = pl.pallas_call(
        _linear_relu_acc_kernel,
        out_shape=jax.ShapeDtypeStruct((M, N), dtype),
        grid=grid,
        in_specs=[
            pl.BlockSpec((tm, tk), lambda i, j, k: (i, k)),   # x tile
            pl.BlockSpec((tn, tk), lambda i, j, k: (j, k)),   # W tile (row-major, no .T)
            pl.BlockSpec((1, tn), lambda i, j, k: (0, j)),    # bias
        ],
        out_specs=pl.BlockSpec((tm, tn), lambda i, j, k: (i, j)),
        scratch_shapes=[pltpu.VMEM((tm, tn), jnp.float32)],
        compiler_params=pltpu.CompilerParams(
            dimension_semantics=("parallel", "parallel", "arbitrary"),
            vmem_limit_bytes=_vmem_limit(stream_bytes)),
    )(x2, w, b2)
    return out.reshape(*orig_lead, N)


if __name__ == "__main__":
    key = jax.random.PRNGKey(0)
    k_x, k_w, k_b = jax.random.split(key, 3)

    batch, seq, hidden = 2, 8, 32
    window_size = 5  # stored by the module but unused in forward()

    x = jax.random.normal(k_x, (batch, seq, hidden), dtype=jnp.float32)

    # nn.Linear default init: U(-1/sqrt(fan_in), 1/sqrt(fan_in)).
    bound = 1.0 / (hidden ** 0.5)
    w = jax.random.uniform(k_w, (hidden, hidden), jnp.float32, -bound, bound)
    b = jax.random.uniform(k_b, (hidden,), jnp.float32, -bound, bound)

    ref = jnp.maximum(x @ w.T + b, 0.0)

    # Single-K (weight-resident) Pallas path.
    out1 = jax.block_until_ready(
        ema_layer_forward(x, w, b, allow_xla_fallback=False))
    assert out1.shape == (batch, seq, hidden)
    assert jnp.allclose(out1, ref, atol=1e-5, rtol=1e-5), float(
        jnp.max(jnp.abs(out1 - ref)))

    # Streaming-K (accumulator) Pallas path, forced via a zero residency budget.
    out2 = jax.block_until_ready(
        ema_layer_forward(x, w, b, allow_xla_fallback=False,
                          single_k_budget_bytes=0))
    assert jnp.allclose(out2, ref, atol=1e-5, rtol=1e-5), float(
        jnp.max(jnp.abs(out2 - ref)))

    print("KERNEL_OK")
</pallas_src>

<mosaic_0001>
module attributes {stable_mosaic.version = 11 : i64} {
  func.func @_linear_relu_kernel(%arg0: i32, %arg1: i32, %arg2: memref<16x32xf32, #tpu.memory_space<vmem>>, %arg3: memref<32x32xf32, #tpu.memory_space<vmem>>, %arg4: memref<1x32xf32, #tpu.memory_space<vmem>>, %arg5: memref<16x32xf32, #tpu.memory_space<vmem>>) attributes {dimension_semantics = [#tpu.dimension_semantics<parallel>, #tpu.dimension_semantics<parallel>], iteration_bounds = array<i64: 1, 1>, scalar_prefetch = 0 : i64, scratch_operands = 0 : i64, tpu.core_type = #tpu.core_type<tc>, window_params = [{transform_indices = @transform_0, window_bounds = array<i64: 16, 32>}, {transform_indices = @transform_1, window_bounds = array<i64: 32, 32>}, {transform_indices = @transform_2, window_bounds = array<i64: 1, 32>}, {transform_indices = @transform_3, window_bounds = array<i64: 16, 32>}]} {
    %c0 = arith.constant 0 : index
    %c0_0 = arith.constant 0 : index
    %0 = vector.load %arg2[%c0, %c0_0] : memref<16x32xf32, #tpu.memory_space<vmem>>, vector<16x32xf32>
    %c0_1 = arith.constant 0 : index
    %c0_2 = arith.constant 0 : index
    %1 = vector.load %arg3[%c0_1, %c0_2] : memref<32x32xf32, #tpu.memory_space<vmem>>, vector<32x32xf32>
    %cst = arith.constant dense<0.000000e+00> : vector<16x32xf32>
    %2 = tpu.matmul %0, %1, %cst {dimension_numbers = #tpu.dot_dimension_numbers<[1], [1], [0], [0], [0, 0, 1, 0], [], []>} : vector<16x32xf32>, vector<32x32xf32>, vector<16x32xf32> -> vector<16x32xf32>
    %c0_3 = arith.constant 0 : index
    %c0_4 = arith.constant 0 : index
    %3 = vector.load %arg4[%c0_3, %c0_4] : memref<1x32xf32, #tpu.memory_space<vmem>>, vector<1x32xf32>
    %4 = vector.broadcast %3 : vector<1x32xf32> to vector<16x32xf32>
    %5 = arith.addf %2, %4 : vector<16x32xf32>
    %cst_5 = arith.constant 0.000000e+00 : f32
    %6 = vector.broadcast %cst_5 : f32 to vector<16x32xf32>
    %7 = arith.maximumf %5, %6 : vector<16x32xf32>
    %c0_6 = arith.constant 0 : index
    %c0_7 = arith.constant 0 : index
    %8 = vector.load %arg5[%c0_6, %c0_7] : memref<16x32xf32, #tpu.memory_space<vmem>>, vector<16x32xf32>
    tpu.vector_store %arg5[%c0_6, %c0_7], %7 {strides = array<i32>} : memref<16x32xf32, #tpu.memory_space<vmem>>, vector<16x32xf32>,
    return
  }
  func.func @transform_0(%arg0: i32, %arg1: i32) -> (i32, i32) {
    %c0_i32 = arith.constant 0 : i32
    %c0_i32_0 = arith.constant 0 : i32
    return %arg0, %c0_i32 : i32, i32
  }
  func.func @transform_1(%arg0: i32, %arg1: i32) -> (i32, i32) {
    %c0_i32 = arith.constant 0 : i32
    %c0_i32_0 = arith.constant 0 : i32
    return %arg1, %c0_i32 : i32, i32
  }
  func.func @transform_2(%arg0: i32, %arg1: i32) -> (i32, i32) {
    %c0_i32 = arith.constant 0 : i32
    %c0_i32_0 = arith.constant 0 : i32
    return %c0_i32, %arg1 : i32, i32
  }
  func.func @transform_3(%arg0: i32, %arg1: i32) -> (i32, i32) {
    %c0_i32 = arith.constant 0 : i32
    return %arg0, %arg1 : i32, i32
  }
}

</mosaic_0001>

<bundles_post_ra>
// kernel: tpu_custom_call.1
= control target key start
LH: loop header
LB: loop body
LE: loop exit
PB: predicated region body
PF: predicated region fallthrough
CT: control target
= control target key end

     0   :  { %8 = vsyncpa [#allocation3], 0  ;;  %s275_s0 = inlined_call_operand.hbm [shape: f32[16,32], index: 0, kind: input, shape index: {}]   ;;  %s276_s1 = inlined_call_operand.hbm [shape: f32[32,32], index: 1, kind: input, shape index: {}]   ;;  %s277_s2 = inlined_call_operand.vmem [shape: f32[1,32], index: 2, kind: input, shape index: {}]   ;;  %s278_s3 = inlined_call_operand.hbm [shape: f32[16,32], index: 3, kind: output, shape index: {}]  }
   0x1   :  { %9 = vsyncpa [#allocation6], 0 }
   0x2   :  { %10 = vsyncpa [#allocation4], 0  ;;  %s15_s14 = sshll.u32 %s275_s0, 4  ;;  %s217_s15 = smov [#allocation2]   ;;  %s16_s14 = int_to_ptr.hbm [resolvable:$true] %s15_s14 }
   0x3   :  { %s17_s16 = sshll.u32 %s217_s15, 4  ;;  %s28_s19 = sshll.u32 %s276_s1, 4  ;;  %s18_s16 = int_to_ptr.vmem [resolvable:$true] %s17_s16  ;;  %s29_s19 = int_to_ptr.hbm [resolvable:$true] %s28_s19 }
   0x4   :  { %s218_s20 = smov 128   ;;  %s219_s21 = smov 8  }
   0x5   :  { %23 = dma.hbm_to_vmem [thread:$0]  %s16_s14, 256, %s18_s16, [#allocation3], %s218_s20, %s218_s20, %s219_s21  }
   0x6   :  { %s220_s22 = smov [#allocation5]  }
   0x7   :  { %s30_s23 = sshll.u32 %s220_s22, 4  ;;  %s31_s23 = int_to_ptr.vmem [resolvable:$true] %s30_s23 }
   0x8   :  { %36 = dma.hbm_to_vmem [thread:$0]  %s29_s19, 512, %s31_s23, [#allocation6], %s218_s20, %s218_s20, %s219_s21  }
   0x9   :  { %211 = dma.done.wait [#allocation3], 256  }
   0xa   :  { %212 = vsyncadd [#allocation3], 4294967040 }
   0xb   :  { %213 = dma.done.wait [#allocation6], 512  }
   0xc   :  { %214 = vsyncadd [#allocation6], 4294966784  ;;  %vm57_vm0 = vcmask 261120   ;;  %v52_v0 = vld [vmem:[#allocation5 + $0x18] sm:$0xff]  ;;  %v51_v1 = vld [vmem:[#allocation5 + $0x10] sm:$0xff]  ;;  %s221_s24 = smov [#allocation7]  }
   0xd   :  { %123 = vmatpush.xpose.msk.msra.mxu0 %vm57_vm0, %v52_v0  ;;  %129 = vmatpush.xpose.msk.msra.mxu1 %vm57_vm0, %v52_v0  ;;  %v50_v2 = vld [vmem:[#allocation5 + $0x8] sm:$0xff]  ;;  %v49_v3 = vld [vmem:[#allocation5] sm:$0xff]  ;;  %v47_v4 = vld [vmem:[#allocation2] sm:$0xff]  ;;  %s107_s25 = sshll.u32 %s221_s24, 4  ;;  %s109_s28 = sshll.u32 %s278_s3, 4  ;;  %s108_s25 = int_to_ptr.vmem [resolvable:$true] %s107_s25  ;;  %s110_s28 = int_to_ptr.hbm [resolvable:$true] %s109_s28 }
   0xe   :  { %v48_v5 = vld [vmem:[#allocation2 + $0x8] sm:$0xff]  ;;  %v138_v6 = vld [vmem:[%s277_s2] ss:$0 sm:$0xff] }
  0x11   :  { %124 = vmatpush.xpose.msk.msra.mxu0 %vm57_vm0, %v51_v1  ;;  %130 = vmatpush.xpose.msk.msra.mxu1 %vm57_vm0, %v51_v1 }
  0x15   :  { %125 = vmatpush.xpose.msk.msra.mxu0 %vm57_vm0, %v50_v2  ;;  %131 = vmatpush.xpose.msk.msra.mxu1 %vm57_vm0, %v50_v2 }
  0x19   :  { %126 = vmatpush.xpose.msk.msra.mxu0 %vm57_vm0, %v49_v3  ;;  %132 = vmatpush.xpose.msk.msra.mxu1 %vm57_vm0, %v49_v3 }
  0x1c   :  { %127 = vmatmul.msk.f32.vlgmr.msra.gmra.mxu0 %vm57_vm0, %v47_v4  ;;  %128 = vmatmul.msk.f32.vlgmr.msra.gmra.mxu1 %vm57_vm0, %v48_v5 }
  0x99   :  { %v93_v7 = vpop.f32.mrf.mxu0  ;;  %v96_v8 = vpop.f32.mrf.mxu1 }
  0x9a   :  { %v94_v9 = vadd.f32 %v138_v6, %v93_v7  ;;  %v97_v10 = vadd.f32 %v138_v6, %v96_v8 }
  0x9c   :  { %v99_v11 = vmax.f32 %v94_v9, 0.0  ;;  %v100_v12 = vmax.f32 %v97_v10, 0.0 }
  0x9e   :  { %101 = vst.msk [vmem:[#allocation7] sm:$0xff] %vm57_vm0, %v99_v11 }
  0x9f   :  { %102 = vst.msk [vmem:[#allocation7 + $0x8] sm:$0xff] %vm57_vm0, %v100_v12 }
  0xa0   :  { %115 = dma.vmem_to_hbm [thread:$0]  %s108_s25, 256, %s110_s28, [#allocation4], %s218_s20, %s218_s20, %s219_s21  }
  0xa1   :  { %215 = dma.done.wait [#allocation4], 256  }
  0xa2   :  { %216 = vsyncadd [#allocation4], 4294967040 }
  0xa3   :  { %120 = vsyncpa [#allocation3], 1 }
  0xa4   :  { %121 = vsyncpa [#allocation6], 1 }
  0xa5   :  { %122 = vsyncpa [#allocation4], 1 }

</bundles_post_ra>
